<compile_context>
chip_gen: v7x
topology: tpu7x:2x2x1
jax: 0.10.0
libtpu: 0.0.40
codegen_flags: <defaults>
</compile_context>

<pallas_src>
import jax
import jax.numpy as jnp
from jax.experimental import pallas as pl
from jax.experimental.pallas import tpu as pltpu

SECONDS_IN_DAY = 24.0 * 60.0 * 60.0
HIGH = jax.lax.Precision.HIGHEST

# ----------------------- model / problem sizes (small) -----------------------
B = 8            # batch (fills the 8 f32 sublanes; stack env states here)
D_DATES = 6      # number of dates in env.data
T_STEPS = 32     # intraday time steps per date
WINDOW = 8       # env.window_size
MAX_UNITS = 5
N_POS = 2 * MAX_UNITS + 1            # 11
C_PRICE = 4                          # PriceDataWindow channels
D_MODEL = 32
P1 = N_POS + 1                       # 12 (one-hot + time)
T_SEQ = WINDOW + 1                   # 9
VOL_SMA_WINDOW = 60                  # PriceDataWindow default

K_DATA = WINDOW * C_PRICE            # 32  flattened price window features
K_IN = K_DATA + P1                   # 44  price features + position features
K_IN1 = K_IN + 1                     # 45  + constant-1 column (bias carry)
K_HID = T_SEQ * D_MODEL              # 288 flattened token sequence
K_HID1 = K_HID + 1                   # 289 + constant-1 column (output bias carry)


# ------------------------------ Pallas kernel --------------------------------
def actor_kernel(x_ref,    # (Bb, K_IN1)    [price_flat | pos_feat | 1]
                 w1_ref,   # (K_IN1, K_HID1) fused lin_data/lin_pos + bias + pos_emb
                 w2_ref,   # (K_HID1, N_POS) fused post-process weight + bias
                 out_ref): # (Bb, N_POS)     softmax output
    # seq_flat[b, t*d + j] == lin_data/lin_pos token t (+ bias + pos_emb);
    # seq_flat[b, K_HID]   == 1.0 (carries the post-process bias through W2).
    seq_flat = jnp.dot(x_ref[...], w1_ref[...], precision=HIGH,
                       preferred_element_type=jnp.float32)
    # TODO(synk): `main_module` is a user-supplied nn.Module in ActorNet with no
    # definition in the source; it is modeled as identity here.
    logits = jnp.dot(seq_flat, w2_ref[...], precision=HIGH,
                     preferred_element_type=jnp.float32)
    m = jnp.max(logits, axis=-1, keepdims=True)
    e = jnp.exp(logits - m)
    out_ref[...] = (e / jnp.sum(e, axis=-1, keepdims=True)).astype(out_ref.dtype)


def actor_pallas(x_aug, w1, w2, *, batch_block=None):
    n_b = x_aug.shape[0]
    bb = n_b if batch_block is None else batch_block
    assert n_b % bb == 0 and bb % 8 == 0, "batch block must be a multiple of 8"
    grid = (n_b // bb,)
    return pl.pallas_call(
        actor_kernel,
        out_shape=jax.ShapeDtypeStruct((n_b, N_POS), jnp.float32),
        grid_spec=pltpu.PrefetchScalarGridSpec(
            num_scalar_prefetch=0,
            grid=grid,
            in_specs=[pl.BlockSpec((bb, K_IN1), lambda i: (i, 0)),
                      pl.BlockSpec((K_IN1, K_HID1), lambda i: (0, 0)),
                      pl.BlockSpec((K_HID1, N_POS), lambda i: (0, 0))],
            out_specs=pl.BlockSpec((bb, N_POS), lambda i: (i, 0)),
        ),
        compiler_params=pltpu.CompilerParams(
            dimension_semantics=("parallel",)),
    )(x_aug, w1, w2)


# ------------------- wrapper-side param folding (done once) ------------------
def build_fused_params(params):
    """Fold (wd, bd, wp, bp, pos_emb, wout3, bout) into two dense slabs."""
    wd, bd, wp, bp, pos_emb, wout3, bout = params
    w1 = jnp.zeros((K_IN1, K_HID1), jnp.float32)
    for t in range(WINDOW):                                     # lin_data, block-diag
        w1 = w1.at[t * C_PRICE:(t + 1) * C_PRICE,
                   t * D_MODEL:(t + 1) * D_MODEL].set(wd)
    w1 = w1.at[K_DATA:K_IN, WINDOW * D_MODEL:K_HID].set(wp)     # lin_pos block
    bias_row = (jnp.concatenate([jnp.tile(bd, (1, WINDOW)), bp], axis=-1)
                + pos_emb.reshape(1, K_HID))                    # bias + positional param
    w1 = w1.at[K_IN, :K_HID].set(bias_row[0])
    w1 = w1.at[K_IN, K_HID].set(1.0)                            # -> seq_flat[:, K_HID] == 1
    w2 = jnp.concatenate([wout3.reshape(K_HID, N_POS), bout], axis=0)   # (289, 11)
    return w1, w2


# -------------------------- plain-JAX glue (setup) ----------------------------
def sma_jnp(x, window):
    """Simple moving average, first element prepended window-1 times (as in sma())."""
    x_pad = jnp.concatenate([jnp.full((window - 1,), x[0], dtype=x.dtype), x])
    idx = jnp.arange(x.shape[0])[:, None] + jnp.arange(window)[None, :]
    return x_pad[idx].mean(axis=1)


def preprocess_price_data(data):
    """PriceDataWindow._pre_process_data + _normalize_data (init-time buffers)."""
    open_ = data[:, :, 1]
    high = data[:, :, 2]
    low = data[:, :, 3]
    close = data[:, :, 4]
    volume = data[:, :, 5]

    prev_close = jnp.concatenate([open_[:, 0:1], close[:, :-1]], axis=1)
    lr_close = jnp.log(close / prev_close)
    lr_high = jnp.log(high / prev_close)
    lr_low = jnp.log(low / prev_close)

    avg_daily_vol = volume.mean(axis=1)                           # (D,)
    sma_vol = sma_jnp(avg_daily_vol, VOL_SMA_WINDOW)[:, None]     # (D, 1)
    vol_ch = volume / sma_vol - 1.0

    price_data = jnp.stack([lr_close, lr_high, lr_low, vol_ch], axis=-1)  # (D, T, 4)

    # normalize (torch .std default is unbiased -> ddof=1)
    lr = price_data[:, :, 0:3]
    lr_mean = lr.mean(axis=1, keepdims=True)
    lr_std = lr.std(axis=1, keepdims=True, ddof=1)
    lr_n = (lr - lr_mean) / lr_std
    vol = price_data[:, :, 3]
    vol_mean = vol.mean(axis=1, keepdims=True)
    vol_std = vol.std(axis=1, keepdims=True, ddof=1)
    vol_n = (vol - vol_mean) / vol_std
    return jnp.concatenate([lr_n, vol_n[:, :, None]], axis=-1).astype(jnp.float32)


def build_features(price_data, time_buf, date_idx, time_idx, pos_idx):
    """EnvOutTransform indexing glue: window gather + one-hot + time scalar."""
    w_range = jnp.arange(-WINDOW, 0, dtype=jnp.int32)
    t_idx = time_idx[:, None] + w_range[None, :]                        # (B, W)
    price_win = price_data[date_idx[:, None], t_idx, :]                 # (B, W, C)
    one_hot = jax.nn.one_hot(pos_idx, N_POS, dtype=jnp.float32)         # (B, n_pos)
    tfeat = time_buf[date_idx, time_idx][:, None]                       # (B, 1)
    pos_feat = jnp.concatenate([one_hot, tfeat], axis=-1)               # (B, P1)
    ones = jnp.ones((price_win.shape[0], 1), jnp.float32)
    x_aug = jnp.concatenate(
        [price_win.reshape(price_win.shape[0], K_DATA), pos_feat, ones], axis=-1)
    return price_win, pos_feat, x_aug                                   # x_aug: (B, 45)


def actor_reference(price_win, pos_feat, params):
    """Pure-JAX reference reproducing the PyTorch forward literally."""
    (wd, bd, wp, bp, pos_emb, wout3, bout) = params
    data_out = jnp.dot(price_win, wd, precision=HIGH) + bd              # (B, W, d)
    pos_out = jnp.dot(pos_feat, wp, precision=HIGH) + bp                # (B, d)
    seq = jnp.concatenate([data_out, pos_out[:, None, :]], axis=1)      # (B, W+1, d)
    seq = seq + pos_emb[None]
    # main_module == identity
    flat = seq.reshape(seq.shape[0], -1)                                # (B, (W+1)*d)
    wout_flat = wout3.reshape(T_SEQ * D_MODEL, N_POS)
    logits = jnp.dot(flat, wout_flat, precision=HIGH) + bout            # (B, n_pos)
    return jax.nn.softmax(logits, axis=-1)


def init_params(key):
    ks = jax.random.split(key, 7)

    def u(k, shape, fan_in):
        s = 1.0 / jnp.sqrt(jnp.float32(fan_in))
        return jax.random.uniform(k, shape, jnp.float32, -s, s)

    wd = u(ks[0], (C_PRICE, D_MODEL), C_PRICE)            # lin_data.weight.T
    bd = u(ks[1], (1, D_MODEL), C_PRICE)                  # lin_data.bias
    wp = u(ks[2], (P1, D_MODEL), P1)                      # lin_pos.weight.T
    bp = u(ks[3], (1, D_MODEL), P1)                       # lin_pos.bias
    # `pos` is nn.Parameter(zeros) in the module; use small deterministic values
    # so the add is actually exercised.
    pos_emb = 0.01 * jax.random.normal(ks[4], (T_SEQ, D_MODEL), jnp.float32)
    wout3 = u(ks[5], (T_SEQ, D_MODEL, N_POS), T_SEQ * D_MODEL)  # LazyLinear.weight.T
    bout = u(ks[6], (1, N_POS), T_SEQ * D_MODEL)
    return (wd, bd, wp, bp, pos_emb, wout3, bout)


def build_env_data(key):
    """Synthetic env.data of shape (D, T, 6): [time, open, high, low, close, volume]."""
    k1, k2, k3, k4 = jax.random.split(key, 4)
    r = 0.01 * jax.random.normal(k1, (D_DATES, T_STEPS), jnp.float32)
    close = 100.0 * jnp.exp(jnp.cumsum(r, axis=1))
    open_ = close * jnp.exp(0.002 * jax.random.normal(k2, close.shape, jnp.float32))
    wiggle = jnp.abs(0.003 * jax.random.normal(k3, close.shape, jnp.float32))
    high = jnp.maximum(open_, close) * jnp.exp(wiggle)
    low = jnp.minimum(open_, close) * jnp.exp(-wiggle)
    volume = 1000.0 * jnp.exp(0.2 * jax.random.normal(k4, close.shape, jnp.float32))
    time_ch = jnp.broadcast_to(
        34200.0 + 60.0 * jnp.arange(T_STEPS, dtype=jnp.float32), (D_DATES, T_STEPS))
    return jnp.stack([time_ch, open_, high, low, close, volume], axis=-1)


if __name__ == "__main__":
    key = jax.random.PRNGKey(0)
    k_data, k_params = jax.random.split(key)

    # --- init-time buffers (PriceDataWindow / EnvOutTransform.__init__) ---
    data = build_env_data(k_data)                          # (D, T, 6)
    price_data = preprocess_price_data(data)               # (D, T, 4)
    time_buf = (data[:, :, 0] / SECONDS_IN_DAY).astype(jnp.float32)

    params = init_params(k_params)
    w1, w2 = build_fused_params(params)                    # done once on params

    # --- forward inputs (stacked env states -> one kernel call) ---
    date_idx = jnp.array([1, 4, 0, 5, 2, 3, 1, 4], dtype=jnp.int32)
    time_idx = jnp.array([12, 20, 9, 30, 15, 25, 8, 18], dtype=jnp.int32)  # in [W, T)
    pos_idx = jnp.array([3, 9, 0, 10, 5, 7, 1, 6], dtype=jnp.int32)        # in [0, n_pos)

    price_win, pos_feat, x_aug = build_features(
        price_data, time_buf, date_idx, time_idx, pos_idx)

    probs = actor_pallas(x_aug, w1, w2, batch_block=B)
    probs = jax.block_until_ready(probs)

    ref = jax.block_until_ready(actor_reference(price_win, pos_feat, params))

    assert probs.shape == (B, N_POS)
    assert jnp.allclose(jnp.sum(probs, axis=-1), 1.0, atol=1e-4)
    assert jnp.allclose(probs, ref, atol=1e-4, rtol=1e-4), (probs, ref)

    print("KERNEL_OK")
</pallas_src>

<mosaic_0001>
module attributes {stable_mosaic.version = 11 : i64} {
  func.func @actor_kernel(%arg0: i32, %arg1: memref<8x45xf32, #tpu.memory_space<vmem>>, %arg2: memref<45x289xf32, #tpu.memory_space<vmem>>, %arg3: memref<289x11xf32, #tpu.memory_space<vmem>>, %arg4: memref<8x11xf32, #tpu.memory_space<vmem>>) attributes {dimension_semantics = [#tpu.dimension_semantics<parallel>], iteration_bounds = array<i64: 1>, scalar_prefetch = 0 : i64, scratch_operands = 0 : i64, tpu.core_type = #tpu.core_type<tc>, window_params = [{transform_indices = @transform_0, window_bounds = array<i64: 8, 45>}, {pipeline_mode = #tpu.pipeline_mode<synchronous>, transform_indices = @transform_1, window_bounds = array<i64: 45, 289>}, {pipeline_mode = #tpu.pipeline_mode<synchronous>, transform_indices = @transform_2, window_bounds = array<i64: 289, 11>}, {transform_indices = @transform_3, window_bounds = array<i64: 8, 11>}]} {
    %c0 = arith.constant 0 : index
    %c0_0 = arith.constant 0 : index
    %0 = vector.load %arg1[%c0, %c0_0] : memref<8x45xf32, #tpu.memory_space<vmem>>, vector<8x45xf32>
    %c0_1 = arith.constant 0 : index
    %c0_2 = arith.constant 0 : index
    %1 = vector.load %arg2[%c0_1, %c0_2] : memref<45x289xf32, #tpu.memory_space<vmem>>, vector<45x289xf32>
    %cst = arith.constant dense<0.000000e+00> : vector<8x289xf32>
    %2 = tpu.matmul %0, %1, %cst {dimension_numbers = #tpu.dot_dimension_numbers<[1], [0], [0], [1], [0, 0, 1, 1], [], []>, precision = #tpu.contract_precision<fp32>} : vector<8x45xf32>, vector<45x289xf32>, vector<8x289xf32> -> vector<8x289xf32>
    %c0_3 = arith.constant 0 : index
    %c0_4 = arith.constant 0 : index
    %3 = vector.load %arg3[%c0_3, %c0_4] : memref<289x11xf32, #tpu.memory_space<vmem>>, vector<289x11xf32>
    %cst_5 = arith.constant dense<0.000000e+00> : vector<8x11xf32>
    %4 = tpu.matmul %2, %3, %cst_5 {dimension_numbers = #tpu.dot_dimension_numbers<[1], [0], [0], [1], [0, 0, 1, 1], [], []>, precision = #tpu.contract_precision<fp32>} : vector<8x289xf32>, vector<289x11xf32>, vector<8x11xf32> -> vector<8x11xf32>
    %cst_6 = arith.constant dense<0xFF800000> : vector<8xf32>
    %5 = vector.multi_reduction <maximumf>, %4, %cst_6 [1] : vector<8x11xf32> to vector<8xf32>
    %6 = vector.shape_cast %5 : vector<8xf32> to vector<8x1xf32>
    %7 = vector.broadcast %6 : vector<8x1xf32> to vector<8x11xf32>
    %8 = arith.subf %4, %7 : vector<8x11xf32>
    %9 = math.exp %8 : vector<8x11xf32>
    %cst_7 = arith.constant dense<0.000000e+00> : vector<8xf32>
    %10 = vector.multi_reduction <add>, %9, %cst_7 [1] : vector<8x11xf32> to vector<8xf32>
    %11 = vector.shape_cast %10 : vector<8xf32> to vector<8x1xf32>
    %12 = vector.broadcast %11 : vector<8x1xf32> to vector<8x11xf32>
    %13 = arith.divf %9, %12 : vector<8x11xf32>
    %c0_8 = arith.constant 0 : index
    %c0_9 = arith.constant 0 : index
    %14 = vector.load %arg4[%c0_8, %c0_9] : memref<8x11xf32, #tpu.memory_space<vmem>>, vector<8x11xf32>
    tpu.vector_store %arg4[%c0_8, %c0_9], %13 {strides = array<i32>} : memref<8x11xf32, #tpu.memory_space<vmem>>, vector<8x11xf32>,
    return
  }
  func.func @transform_0(%arg0: i32) -> (i32, i32) {
    %c0_i32 = arith.constant 0 : i32
    %c0_i32_0 = arith.constant 0 : i32
    return %arg0, %c0_i32 : i32, i32
  }
  func.func @transform_1(%arg0: i32) -> (i32, i32) {
    %c0_i32 = arith.constant 0 : i32
    %c0_i32_0 = arith.constant 0 : i32
    %c0_i32_1 = arith.constant 0 : i32
    return %c0_i32, %c0_i32_0 : i32, i32
  }
  func.func @transform_2(%arg0: i32) -> (i32, i32) {
    %c0_i32 = arith.constant 0 : i32
    %c0_i32_0 = arith.constant 0 : i32
    %c0_i32_1 = arith.constant 0 : i32
    return %c0_i32, %c0_i32_0 : i32, i32
  }
  func.func @transform_3(%arg0: i32) -> (i32, i32) {
    %c0_i32 = arith.constant 0 : i32
    %c0_i32_0 = arith.constant 0 : i32
    return %arg0, %c0_i32 : i32, i32
  }
}

</mosaic_0001>

<bundles_post_ra>
// kernel: tpu_custom_call.1
= control target key start
LH: loop header
LB: loop body
LE: loop exit
PB: predicated region body
PF: predicated region fallthrough
CT: control target
= control target key end

     0   :  { %vm38_vm0 = vcmask 1044480   ;;  %v4322_v3 = vmov 0.0|0.0   ;;  %v4320_v10 = vmov 0.0   ;;  %vm3461_vm1 = vmmov 0   ;;  %s4315_s0 = inlined_call_operand.vmem [shape: f32[8,45], index: 0, kind: input, shape index: {}]   ;;  %s4316_s1 = inlined_call_operand.vmem [shape: f32[45,289], index: 1, kind: input, shape index: {}]   ;;  %s4317_s2 = inlined_call_operand.vmem [shape: f32[289,11], index: 2, kind: input, shape index: {}]   ;;  %s4318_s3 = inlined_call_operand.hbm [shape: f32[8,11], index: 3, kind: output, shape index: {}]  }
   0x1   :  { %v17_v0 = vld [vmem:[%s4316_s1 + $0x8] sm:$0xff]  ;;  %v20_v1 = vld [vmem:[%s4316_s1 + $0x20] sm:$0xff]  ;;  %v18_v2 = vld [vmem:[%s4316_s1 + $0x10] sm:$0xff]  ;;  %3114 = vmatprep.subr.bf16.mxu1 %v4322_v3  ;;  %124 = vmatprep.mubr.f32.mxu0 %v4320_v10  ;;  %vm34_vm2 = vcmask 367616  }
   0x2   :  { %v48_v4 = vand.u32 4294901760, %v17_v0  ;;  %v52_v5 = vand.u32 4294901760, %v20_v1  ;;  %v21_v6 = vld [vmem:[%s4316_s1 + $0x28] sm:$0xff]  ;;  %v644_v7 = vand.u32 4294901760, %v18_v2  ;;  %v16_v8 = vld [vmem:[%s4316_s1] sm:$0xff]  ;;  %v19_v9 = vld [vmem:[%s4316_s1 + $0x18] sm:$0xff]  ;;  %2886 = vmatprep.mubr.msk.f32.mxu1 %vm3461_vm1, %v4320_v10 }
   0x3   :  { %v647_v11 = vand.u32 4294901760, %v21_v6  ;;  %v50_v12 = vand.u32 4294901760, %v16_v8  ;;  %v54_v13 = vand.u32 4294901760, %v19_v9  ;;  %v23_v14 = vld [vmem:[%s4316_s1 + $0x38] sm:$0xff]  ;;  %v26_v15 = vld [vmem:[%s4316_s1 + $0x50] sm:$0xff]  ;;  %v24_v16 = vld [vmem:[%s4316_s1 + $0x40] sm:$0xff] }
   0x4   :  { %v3512_v17 = vpack.c.bf16 %v52_v5, %v48_v4  ;;  %v3514_v18 = vsub.f32 %v17_v0, %v48_v4  ;;  %v3516_v19 = vsub.f32 %v20_v1, %v52_v5  ;;  %v3518_v20 = vsub.f32 %v18_v2, %v644_v7  ;;  %v27_v21 = vld [vmem:[%s4316_s1 + $0x58] sm:$0xff]  ;;  %v22_v22 = vld [vmem:[%s4316_s1 + $0x30] sm:$0xff]  ;;  %v25_v23 = vld [vmem:[%s4316_s1 + $0x48] sm:$0xff] }
   0x5   :  { %v3529_v24 = vpack.c.bf16 %v647_v11, %v644_v7  ;;  %v3531_v25 = vsub.f32 %v21_v6, %v647_v11  ;;  %v3533_v26 = vpack.c.bf16 %v54_v13, %v50_v12  ;;  %v3535_v27 = vsub.f32 %v16_v8, %v50_v12  ;;  %v32_v28 = vld [vmem:[%s4316_s1 + $0x80] sm:$0x1f]  ;;  %v29_v33 = vld [vmem:[%s4316_s1 + $0x68] sm:$0xff]  ;;  %v30_v43 = vld [vmem:[%s4316_s1 + $0x70] sm:$0xff] }
   0x6   :  { %3043 = vmatprep.subr.bf16.mxu0 %v3512_v17  ;;  %v3541_v29 = vsub.f32 %v19_v9, %v54_v13  ;;  %v56_v30 = vand.u32 4294901760, %v23_v14  ;;  %v60_v31 = vand.u32 4294901760, %v26_v15  ;;  %v650_v32 = vand.u32 4294901760, %v24_v16  ;;  %v33_v38 = vld [vmem:[%s4316_s1 + $0x88] sm:$0x1f]  ;;  %v28_v44 = vld [vmem:[%s4316_s1 + $0x60] sm:$0xff] }
   0x7   :  { %3116 = vmatpush3.bf16.msra.mxu1 %v3529_v24  ;;  %3045 = vmatpush1.bf16.msra.mxu0 %v3533_v26  ;;  %v653_v34 = vand.u32 4294901760, %v27_v21  ;;  %v58_v35 = vand.u32 4294901760, %v22_v22  ;;  %v62_v36 = vand.u32 4294901760, %v25_v23  ;;  %v43_v37 = vsel %vm38_vm0, %v32_v28, 0  ;;  %v31_v45 = vld [vmem:[%s4316_s1 + $0x78] sm:$0x1f] }
   0x8   :  { %3117 = vmatprep.subr.bf16.mxu1 %v4322_v3  ;;  %v3553_v39 = vpack.c.bf16 %v60_v31, %v56_v30  ;;  %v3555_v40 = vsub.f32 %v23_v14, %v56_v30  ;;  %v3557_v41 = vsub.f32 %v26_v15, %v60_v31  ;;  %v3559_v42 = vsub.f32 %v24_v16, %v650_v32  ;;  %v15_v2 = vld [vmem:[%s4315_s0] sm:$0xff] }
   0x9   :  { %v3570_v46 = vpack.c.bf16 %v653_v34, %v650_v32  ;;  %v3572_v47 = vsub.f32 %v27_v21, %v653_v34  ;;  %v3574_v48 = vpack.c.bf16 %v62_v36, %v58_v35  ;;  %v3576_v49 = vsub.f32 %v22_v22, %v58_v35 }
   0xa   :  { %3047 = vmatprep.subr.bf16.mxu0 %v3553_v39  ;;  %v3579_v50 = vsub.f32 %v25_v23, %v62_v36  ;;  %v64_v51 = vand.u32 4294901760, %v29_v33  ;;  %v68_v52 = vand.u32 4294901760, %v43_v37  ;;  %v46_v53 = vsel %vm38_vm0, %v33_v38, 0 }
   0xb   :  { %3119 = vmatpush3.bf16.msra.mxu1 %v3570_v46  ;;  %3049 = vmatpush1.bf16.msra.mxu0 %v3574_v48  ;;  %v656_v54 = vand.u32 4294901760, %v30_v43  ;;  %v659_v55 = vand.u32 4294901760, %v46_v53  ;;  %v40_v56 = vsel %vm38_vm0, %v31_v45, 0  ;;  %v66_v57 = vand.u32 4294901760, %v28_v44 }
   0xc   :  { %3120 = vmatprep.subr.bf16.mxu1 %v4322_v3  ;;  %v3586_v58 = vpack.c.bf16 %v68_v52, %v64_v51  ;;  %v3588_v59 = vsub.f32 %v29_v33, %v64_v51  ;;  %v3590_v60 = vsub.f32 %v43_v37, %v68_v52  ;;  %v70_v61 = vand.u32 4294901760, %v40_v56 }
   0xd   :  { %v3592_v62 = vpack.c.bf16 %v659_v55, %v656_v54  ;;  %v3594_v63 = vsub.f32 %v30_v43, %v656_v54  ;;  %v3596_v0 = vsub.f32 %v46_v53, %v659_v55  ;;  %v3598_v1 = vsub.f32 %v28_v44, %v66_v57 }
   0xe   :  { %3051 = vmatprep.subr.bf16.mxu0 %v3586_v58  ;;  %v3604_v4 = vpack.c.bf16 %v70_v61, %v66_v57  ;;  %v3606_v5 = vsub.f32 %v40_v56, %v70_v61  ;;  %v138_v6 = vand.u32 4294901760, %v3514_v18  ;;  %v150_v7 = vand.u32 4294901760, %v3516_v19 }
   0xf   :  { %3122 = vmatpush3.bf16.msra.mxu1 %v3592_v62  ;;  %v727_v8 = vand.u32 4294901760, %v3518_v20  ;;  %v734_v9 = vand.u32 4294901760, %v3531_v25  ;;  %v36_v12 = vsel %vm34_vm2, %v15_v2, 0  ;;  %v144_v13 = vand.u32 4294901760, %v3535_v27 }
  0x10   :  { %3053 = vmatpush1.bf16.msra.mxu0 %v3604_v4  ;;  %3123 = vmatprep.subr.bf16.mxu1 %v4322_v3  ;;  %v139_v11 = vsub.f32 %v3514_v18, %v138_v6  ;;  %v156_v14 = vand.u32 4294901760, %v3541_v29  ;;  %v151_v15 = vsub.f32 %v3516_v19, %v150_v7  ;;  %v3625_v16 = vand.u32 4294901760, %v36_v12 }
  0x11   :  { %v728_v21 = vsub.f32 %v3518_v20, %v727_v8  ;;  %v735_v22 = vsub.f32 %v3531_v25, %v734_v9 }
  0x12   :  { %8 = vsyncpa [#allocation3], 0  ;;  %v140_v23 = vand.u32 4294901760, %v139_v11  ;;  %v145_v28 = vsub.f32 %v3535_v27, %v144_v13  ;;  %v157_v30 = vsub.f32 %v3541_v29, %v156_v14  ;;  %v162_v31 = vand.u32 4294901760, %v3555_v40 }
  0x13   :  { %v152_v32 = vand.u32 4294901760, %v151_v15  ;;  %v3641_v33 = vsub.f32 %v36_v12, %v3625_v16  ;;  %v729_v34 = vand.u32 4294901760, %v728_v21  ;;  %v736_v35 = vand.u32 4294901760, %v735_v22 }
  0x14   :  { %v146_v36 = vand.u32 4294901760, %v145_v28  ;;  %v158_v37 = vand.u32 4294901760, %v157_v30  ;;  %v163_v38 = vsub.f32 %v3555_v40, %v162_v31  ;;  %v174_v43 = vand.u32 4294901760, %v3557_v41 }
  0x15   :  { %v3054_v44 = vpack.c.bf16 %v152_v32, %v140_v23  ;;  %v3648_v45 = vand.u32 4294901760, %v3641_v33  ;;  %v3124_v51 = vpack.c.bf16 %v736_v35, %v729_v34  ;;  %v741_v52 = vand.u32 4294901760, %v3559_v42 }
  0x16   :  { %v3056_v53 = vpack.c.bf16 %v158_v37, %v146_v36  ;;  %v164_v54 = vand.u32 4294901760, %v163_v38  ;;  %v175_v55 = vsub.f32 %v3557_v41, %v174_v43  ;;  %v748_v56 = vand.u32 4294901760, %v3572_v47 }
  0x17   :  { %3055 = vmatprep.subr.bf16.mxu0 %v3054_v44  ;;  %v128_v57 = vsub.f32 %v3641_v33, %v3648_v45  ;;  %v742_v61 = vsub.f32 %v3559_v42, %v741_v52  ;;  %v168_v2 = vand.u32 4294901760, %v3576_v49  ;;  %v180_v11 = vand.u32 4294901760, %v3579_v50 }
  0x18   :  { %v176_v12 = vand.u32 4294901760, %v175_v55  ;;  %v749_v15 = vsub.f32 %v3572_v47, %v748_v56  ;;  %v4319_v21 = vand.u32 4294901760, %v3588_v59  ;;  %v198_v22 = vand.u32 4294901760, %v3590_v60 }
  0x19   :  { %v129_v23 = vand.u32 4294901760, %v128_v57  ;;  %v743_v28 = vand.u32 4294901760, %v742_v61  ;;  %v169_v30 = vsub.f32 %v3576_v49, %v168_v2  ;;  %v181_v32 = vsub.f32 %v3579_v50, %v180_v11 }
  0x1a   :  { %v3058_v34 = vpack.c.bf16 %v176_v12, %v164_v54  ;;  %v750_v35 = vand.u32 4294901760, %v749_v15  ;;  %v187_v36 = vsub.f32 %v3588_v59, %v4319_v21  ;;  %v199_v37 = vsub.f32 %v3590_v60, %v198_v22 }
  0x1b   :  { %2887 = vmatmul.mubr.f32.vlgmr.msra.gmra.mrb[0].mxu1 %v129_v23  ;;  %130 = vmatmul.mubr.f32.vlgmr.msra.gmra.mrb[0].mxu0 %v129_v23  ;;  %v170_v38 = vand.u32 4294901760, %v169_v30  ;;  %v182_v44 = vand.u32 4294901760, %v181_v32  ;;  %v755_v55 = vand.u32 4294901760, %v3594_v63  ;;  %v762_v57 = vand.u32 4294901760, %v3596_v0 }
  0x1c   :  { %3125 = vmatpush3.bf16.msra.mxu1 %v3124_v51  ;;  %3057 = vmatpush1.bf16.msra.mxu0 %v3056_v53  ;;  %v3127_v54 = vpack.c.bf16 %v750_v35, %v743_v28  ;;  %v188_v61 = vand.u32 4294901760, %v187_v36  ;;  %v200_v12 = vand.u32 4294901760, %v199_v37  ;;  %v192_v15 = vand.u32 4294901760, %v3598_v1 }
  0x1d   :  { %3126 = vmatprep.subr.bf16.mxu1 %v4322_v3  ;;  %3059 = vmatprep.subr.bf16.mxu0 %v3058_v34  ;;  %v3060_v21 = vpack.c.bf16 %v182_v44, %v170_v38  ;;  %v756_v23 = vsub.f32 %v3594_v63, %v755_v55  ;;  %v763_v30 = vsub.f32 %v3596_v0, %v762_v57  ;;  %v204_v51 = vand.u32 4294901760, %v3606_v5 }
  0x1e   :  { %v3062_v53 = vpack.c.bf16 %v200_v12, %v188_v61  ;;  %v193_v28 = vsub.f32 %v3598_v1, %v192_v15  ;;  %2901 = vmatprep.mubr.msk.f32.mxu1 %vm3461_vm1, %v4320_v10  ;;  %260 = vmatprep.mubr.f32.mxu0 %v4320_v10  ;;  %v3066_v44 = vpack.c.bf16 %v3516_v19, %v3514_v18  ;;  %vm1191_vm3 = vcmask 269312  }
  0x1f   :  { %v757_v32 = vand.u32 4294901760, %v756_v23  ;;  %v764_v34 = vand.u32 4294901760, %v763_v30  ;;  %v205_v35 = vsub.f32 %v3606_v5, %v204_v51  ;;  %v3133_v12 = vpack.c.bf16 %v3531_v25, %v3518_v20 }
  0x20   :  { %3128 = vmatpush3.bf16.msra.mxu1 %v3127_v54  ;;  %3061 = vmatpush1.bf16.msra.mxu0 %v3060_v21  ;;  %v194_v36 = vand.u32 4294901760, %v193_v28  ;;  %v3068_v21 = vpack.c.bf16 %v3541_v29, %v3535_v27  ;;  %v3070_v54 = vpack.c.bf16 %v3557_v41, %v3555_v40  ;;  %v3136_v23 = vpack.c.bf16 %v3572_v47, %v3559_v42  ;;  %v1170_v41 = vld [vmem:[%s4317_s2 + $0x80] sm:$0xff]  ;;  %v1171_v42 = vld [vmem:[%s4317_s2 + $0x88] sm:$0xff] }
  0x21   :  { %3129 = vmatprep.subr.bf16.mxu1 %v4322_v3  ;;  %3063 = vmatprep.subr.bf16.mxu0 %v3062_v53  ;;  %v3130_v37 = vpack.c.bf16 %v764_v34, %v757_v32  ;;  %v206_v38 = vand.u32 4294901760, %v205_v35  ;;  %v3072_v30 = vpack.c.bf16 %v3579_v50, %v3576_v49  ;;  %v3074_v53 = vpack.c.bf16 %v3590_v60, %v3588_v59  ;;  %v1154_v47 = vld [vmem:[%s4317_s2] sm:$0xff]  ;;  %v1155_v49 = vld [vmem:[%s4317_s2 + $0x8] sm:$0xff]  ;;  %v1172_v60 = vld [vmem:[%s4317_s2 + $0x90] sm:$0xff] }
  0x22   :  { %v3139_v28 = vpack.c.bf16 %v3596_v0, %v3594_v63  ;;  %v3076_v32 = vpack.c.bf16 %v3606_v5, %v3598_v1  ;;  %v3151_v34 = vpack.c.bf16 %v734_v9, %v727_v8  ;;  %v3092_v35 = vpack.c.bf16 %v156_v14, %v144_v13  ;;  %v1173_v63 = vld [vmem:[%s4317_s2 + $0x98] sm:$0xff]  ;;  %v1174_v9 = vld [vmem:[%s4317_s2 + $0xa0] sm:$0xff] }
  0x23   :  { %v3064_v61 = vpack.c.bf16 %v206_v38, %v194_v36  ;;  %v3094_v18 = vpack.c.bf16 %v174_v43, %v162_v31  ;;  %v3154_v19 = vpack.c.bf16 %v748_v56, %v741_v52  ;;  %v3096_v20 = vpack.c.bf16 %v180_v11, %v168_v2  ;;  %v1157_v5 = vld [vmem:[%s4317_s2 + $0x18] sm:$0xff]  ;;  %v1158_v56 = vld [vmem:[%s4317_s2 + $0x20] sm:$0xff] }
  0x24   :  { %3131 = vmatpush3.bf16.msra.mxu1 %v3130_v37  ;;  %v4339_v25 = vand.u32 4294901760, %v3588_v59  ;;  %v3157_v29 = vpack.c.bf16 %v762_v57, %v755_v55  ;;  %v3100_v40 = vpack.c.bf16 %v204_v51, %v192_v15  ;;  %v1248_v50 = vand.u32 4294901760, %v1170_v41  ;;  %v1176_v57 = vld [vmem:[%s4317_s2 + $0xb0] sm:$0xff] }
  0x25   :  { %3065 = vmatpush1.bf16.msra.mxu0 %v3064_v61  ;;  %3132 = vmatprep.subr.bf16.mxu1 %v4322_v3  ;;  %v1251_v59 = vand.u32 4294901760, %v1171_v42  ;;  %v1200_v0 = vand.u32 4294901760, %v1154_v47  ;;  %v1203_v1 = vand.u32 4294901760, %v1155_v49  ;;  %v1257_v8 = vand.u32 4294901760, %v1173_v63 }
  0x26   :  { %3067 = vmatprep.subr.bf16.mxu0 %v3066_v44  ;;  %v3098_v27 = vpack.c.bf16 %v198_v22, %v4339_v25  ;;  %v1209_v13 = vand.u32 4294901760, %v1157_v5  ;;  %v1212_v36 = vand.u32 4294901760, %v1158_v56  ;;  %vm1195_vm4 = vcmask 1040384  }
  0x27   :  { %2902 = vmatmul.mubr.f32.vlgmr.msra.gmra.mrb[0].mxu1 %v3625_v16  ;;  %v3833_v14 = vsub.f32 %v1154_v47, %v1200_v0  ;;  %v3835_v31 = vsub.f32 %v1155_v49, %v1203_v1  ;;  %v3839_v43 = vpack.c.bf16 %v1251_v59, %v1248_v50  ;;  %v3849_v11 = vsub.f32 %v1173_v63, %v1257_v8  ;;  %v3927_v47 = vld [vmem:[%s4317_s2 + $0xd8] sm:$0xff] }
  0x28   :  { %3134 = vmatpush3.bf16.msra.mxu1 %v3133_v12  ;;  %262 = vmatmul.mubr.f32.vlgmr.msra.gmra.mrb[0].mxu0 %v3625_v16  ;;  %v3856_v55 = vsub.f32 %v1157_v5, %v1209_v13  ;;  %v3867_v51 = vpack.c.bf16 %v1203_v1, %v1200_v0  ;;  %v1161_v12 = vld [vmem:[%s4317_s2 + $0x38] sm:$0xff]  ;;  %vm2559_vm5 = vcmask 89088  }
  0x29   :  { %3069 = vmatpush1.bf16.msra.mxu0 %v3068_v21  ;;  %3135 = vmatprep.subr.bf16.mxu1 %v4322_v3  ;;  %v3234_v15 = vpack.c.bf16 %v3835_v31, %v3833_v14  ;;  %v1266_v21 = vand.u32 4294901760, %v1176_v57 }
  0x2a   :  { %3071 = vmatprep.subr.bf16.mxu0 %v3070_v54  ;;  %2916 = vmatprep.mubr.msk.f32.mxu1 %vm3461_vm1, %v4320_v10 }
  0x2b   :  { %356 = vmatprep.mubr.f32.mxu0 %v4320_v10  ;;  %v3913_v25 = vsub.f32 %v1176_v57, %v1266_v21 }
  0x2c   :  { %3137 = vmatpush3.bf16.msra.mxu1 %v3136_v23 }
  0x2d   :  { %3073 = vmatpush1.bf16.msra.mxu0 %v3072_v30  ;;  %3138 = vmatprep.subr.bf16.mxu1 %v4322_v3  ;;  %v1178_v30 = vld [vmem:[%s4317_s2 + $0xc0] sm:$0xff] }
  0x2e   :  { %3075 = vmatprep.subr.bf16.mxu0 %v3074_v53  ;;  %v1179_v53 = vld [vmem:[%s4317_s2 + $0xc8] sm:$0xff] }
  0x30   :  { %3140 = vmatpush3.bf16.msra.mxu1 %v3139_v28  ;;  %v3896_v28 = vsub.f32 %v1158_v56, %v1212_v36 }
  0x31   :  { %3077 = vmatpush1.bf16.msra.mxu0 %v3076_v32  ;;  %3141 = vmatprep.subr.bf16.mxu1 %v4322_v3 }
  0x32   :  { %3079 = vmatprep.subr.bf16.mxu0 %v3512_v17 }
  0x33   :  { %2917 = vmatmul.mubr.f32.vlgmr.msra.gmra.mrb[0].mxu1 %v3641_v33 }
  0x34   :  { %3143 = vmatpush3.bf16.msra.mxu1 %v3529_v24  ;;  %359 = vmatmul.mubr.f32.vlgmr.msra.gmra.mrb[0].mxu0 %v3641_v33  ;;  %v3090_v33 = vpack.c.bf16 %v150_v7, %v138_v6  ;;  %v3823_v6 = vsub.f32 %v1171_v42, %v1251_v59  ;;  %v1254_v7 = vand.u32 4294901760, %v1172_v60 }
  0x35   :  { %3081 = vmatpush1.bf16.msra.mxu0 %v3533_v26  ;;  %3144 = vmatprep.subr.bf16.mxu1 %v4322_v3 }
  0x36   :  { %3083 = vmatprep.subr.bf16.mxu0 %v3553_v39  ;;  %2931 = vmatprep.mubr.msk.f32.mxu1 %vm3461_vm1, %v4320_v10  ;;  %v3847_v2 = vsub.f32 %v1172_v60, %v1254_v7  ;;  %v3875_v61 = vpack.c.bf16 %v1257_v8, %v1254_v7  ;;  %v1281_v8 = vand.u32 4294901760, %v3927_v47 }
  0x37   :  { %441 = vmatprep.mubr.f32.mxu0 %v4320_v10 }
  0x38   :  { %3146 = vmatpush3.bf16.msra.mxu1 %v3570_v46 }
  0x39   :  { %3085 = vmatpush1.bf16.msra.mxu0 %v3574_v48  ;;  %3147 = vmatprep.subr.bf16.mxu1 %v4322_v3 }
  0x3a   :  { %3087 = vmatprep.subr.bf16.mxu0 %v3586_v58 }
  0x3c   :  { %3149 = vmatpush3.bf16.msra.mxu1 %v3592_v62 }
  0x3d   :  { %3089 = vmatpush1.bf16.msra.mxu0 %v3604_v4  ;;  %3150 = vmatprep.subr.bf16.mxu1 %v4322_v3 }
  0x3e   :  { %3091 = vmatprep.subr.bf16.mxu0 %v3090_v33 }
  0x3f   :  { %2932 = vmatmul.mubr.f32.vlgmr.msra.gmra.mrb[0].mxu1 %v3648_v45 }
  0x40   :  { %3152 = vmatpush3.bf16.msra.mxu1 %v3151_v34  ;;  %445 = vmatmul.mubr.f32.vlgmr.msra.gmra.mrb[0].mxu0 %v3648_v45  ;;  %v1260_v45 = vand.u32 4294901760, %v1174_v9  ;;  %v1221_v34 = vand.u32 4294901760, %v1161_v12 }
  0x41   :  { %3093 = vmatpush1.bf16.msra.mxu0 %v3092_v35  ;;  %3153 = vmatprep.subr.bf16.mxu1 %v4322_v3 }
  0x42   :  { %3095 = vmatprep.subr.bf16.mxu0 %v3094_v18  ;;  %2946 = vmatprep.mubr.msk.f32.mxu1 %vm3461_vm1, %v4320_v10  ;;  %v3871_v37 = vsub.f32 %v1174_v9, %v1260_v45  ;;  %v1164_v9 = vld [vmem:[%s4317_s2 + $0x50] sm:$0xff] }
  0x43   :  { %551 = vmatprep.mubr.f32.mxu0 %v4320_v10  ;;  %v1230_v57 = vand.u32 4294901760, %v1164_v9 }
  0x44   :  { %3155 = vmatpush3.bf16.msra.mxu1 %v3154_v19 }
  0x45   :  { %3097 = vmatpush1.bf16.msra.mxu0 %v3096_v20  ;;  %3156 = vmatprep.subr.bf16.mxu1 %v4322_v3  ;;  %v1163_v20 = vld [vmem:[%s4317_s2 + $0x48] sm:$0xff] }
  0x46   :  { %3099 = vmatprep.subr.bf16.mxu0 %v3098_v27  ;;  %v1227_v60 = vand.u32 4294901760, %v1163_v20 }
  0x48   :  { %3158 = vmatpush3.bf16.msra.mxu1 %v3157_v29  ;;  %v1272_v29 = vand.u32 4294901760, %v1178_v30  ;;  %v3968_v56 = vsub.f32 %v1163_v20, %v1227_v60  ;;  %v1167_v20 = vld [vmem:[%s4317_s2 + $0x68] sm:$0xff] }
  0x49   :  { %3101 = vmatpush1.bf16.msra.mxu0 %v3100_v40  ;;  %3159 = vmatprep.subr.bf16.mxu1 %v4322_v3  ;;  %v1275_v40 = vand.u32 4294901760, %v1179_v53 }
  0x4a   :  { %3103 = vmatprep.subr.bf16.mxu0 %v3512_v17  ;;  %v1156_v17 = vld [vmem:[%s4317_s2 + $0x10] sm:$0xff]  ;;  %v3942_v5 = vsub.f32 %v1178_v30, %v1272_v29 }
  0x4b   :  { %2947 = vmatmul.mubr.f32.vlgmr.msra.gmra.mrb[0].mxu1 %v3625_v16  ;;  %v3944_v7 = vsub.f32 %v1179_v53, %v1275_v40 }
  0x4c   :  { %3161 = vmatpush3.bf16.msra.mxu1 %v3529_v24  ;;  %553 = vmatmul.mubr.f32.vlgmr.msra.gmra.mrb[0].mxu0 %v3625_v16  ;;  %v3821_v24 = vsub.f32 %v1170_v41, %v1248_v50  ;;  %v3920_v41 = vld [vmem:[%s4317_s2 + $0xd0] sm:$0xff]  ;;  %v3932_v50 = vsub.f32 %v1161_v12, %v1221_v34 }
  0x4d   :  { %3105 = vmatpush1.bf16.msra.mxu0 %v3533_v26  ;;  %3162 = vmatprep.subr.bf16.mxu1 %v4322_v3  ;;  %v1175_v26 = vld [vmem:[%s4317_s2 + $0xa8] sm:$0xff]  ;;  %v1278_v1 = vand.u32 4294901760, %v3920_v41 }
  0x4e   :  { %3107 = vmatprep.subr.bf16.mxu0 %v3553_v39  ;;  %2961 = vmatprep.mubr.msk.f32.mxu1 %vm3461_vm1, %v4320_v10  ;;  %v1206_v39 = vand.u32 4294901760, %v1156_v17  ;;  %v1263_v52 = vand.u32 4294901760, %v1175_v26 }
  0x4f   :  { %635 = vmatprep.mubr.f32.mxu0 %v4320_v10 }
  0x50   :  { %3164 = vmatpush3.bf16.msra.mxu1 %v3570_v46  ;;  %v3232_v46 = vpack.c.bf16 %v3823_v6, %v3821_v24  ;;  %v3854_v22 = vsub.f32 %v1156_v17, %v1206_v39  ;;  %v3873_v38 = vsub.f32 %v1175_v26, %v1263_v52  ;;  %v3898_v32 = vpack.c.bf16 %v1209_v13, %v1206_v39  ;;  %v1165_v26 = vld [vmem:[%s4317_s2 + $0x58] sm:$0xff]  ;;  %v3956_v39 = vld [vmem:[%s4317_s2 + $0xe0] sm:$0xff]  ;;  %v3961_v13 = vld [vmem:[%s4317_s2 + $0xe8] sm:$0xff] }
  0x51   :  { %3109 = vmatpush1.bf16.msra.mxu0 %v3574_v48  ;;  %3165 = vmatprep.subr.bf16.mxu1 %v4322_v3  ;;  %v1159_v48 = vld [vmem:[%s4317_s2 + $0x28] sm:$0xff]  ;;  %v3905_v19 = vpack.c.bf16 %v1263_v52, %v1260_v45  ;;  %v1287_v12 = vand.u32 4294901760, %v3961_v13 }
  0x52   :  { %3111 = vmatprep.subr.bf16.mxu0 %v3586_v58  ;;  %v1177_v58 = vld [vmem:[%s4317_s2 + $0xb8] sm:$0xff]  ;;  %v1215_v44 = vand.u32 4294901760, %v1159_v48  ;;  %v3238_v23 = vpack.c.bf16 %v3856_v55, %v3854_v22  ;;  %v3240_v35 = vpack.c.bf16 %v3873_v38, %v3871_v37 }
  0x53   :  { %v1269_v54 = vand.u32 4294901760, %v1177_v58 }
  0x54   :  { %3167 = vmatpush3.bf16.msra.mxu1 %v3592_v62  ;;  %v1160_v62 = vld [vmem:[%s4317_s2 + $0x30] sm:$0xff]  ;;  %v3902_v18 = vsub.f32 %v1159_v48, %v1215_v44  ;;  %v3922_v42 = vpack.c.bf16 %v1215_v44, %v1212_v36  ;;  %v3974_v48 = vsub.f32 %v3920_v41, %v1278_v1  ;;  %v3248_v36 = vpack.c.bf16 %v3944_v7, %v3942_v5 }
  0x55   :  { %3113 = vmatpush1.bf16.msra.mxu0 %v3604_v4  ;;  %3169 = vmatprep.subr.bf16.mxu1 %v3839_v43  ;;  %v3236_v4 = vpack.c.bf16 %v3849_v11, %v3847_v2  ;;  %v1218_v33 = vand.u32 4294901760, %v1160_v62  ;;  %v3915_v27 = vsub.f32 %v1177_v58, %v1269_v54  ;;  %v3937_v0 = vpack.c.bf16 %v1269_v54, %v1266_v21 }
  0x56   :  { %3233 = vmatprep.subr.bf16.mxu0 %v3232_v46  ;;  %v3242_v63 = vpack.c.bf16 %v3902_v18, %v3896_v28  ;;  %v1233_v58 = vand.u32 4294901760, %v1165_v26  ;;  %v3981_v44 = vsub.f32 %v3927_v47, %v1281_v8  ;;  %v3990_v54 = vsub.f32 %v1164_v9, %v1230_v57  ;;  %v1168_v9 = vld [vmem:[%s4317_s2 + $0x70] sm:$0xff] }
  0x57   :  { %2962 = vmatmul.mubr.f32.vlgmr.msra.gmra.mrb[0].mxu1 %v3625_v16  ;;  %v3930_v49 = vsub.f32 %v1160_v62, %v1218_v33  ;;  %v3244_v17 = vpack.c.bf16 %v3915_v27, %v3913_v25  ;;  %v3970_v46 = vpack.c.bf16 %v1221_v34, %v1218_v33  ;;  %v1284_v62 = vand.u32 4294901760, %v3956_v39 }
  0x58   :  { %637 = vmatmul.mubr.f32.vlgmr.msra.gmra.mrb[0].mxu0 %v3625_v16  ;;  %3171 = vmatpush3.bf16.msra.mxu1 %v3867_v51  ;;  %v1162_v16 = vld [vmem:[%s4317_s2 + $0x40] sm:$0xff]  ;;  %v3252_v30 = vpack.c.bf16 %v3981_v44, %v3974_v48  ;;  %v4001_v33 = vsub.f32 %v3961_v13, %v1287_v12  ;;  %v1242_v13 = vand.u32 4294901760, %v1168_v9 }
  0x59   :  { %3235 = vmatpush3.bf16.msra.mxu0 %v3234_v15  ;;  %3173 = vmatprep.subr.bf16.mxu1 %v3875_v61  ;;  %v1224_v59 = vand.u32 4294901760, %v1162_v16  ;;  %v3246_v45 = vpack.c.bf16 %v3932_v50, %v3930_v49  ;;  %v3976_v15 = vpack.c.bf16 %v1275_v40, %v1272_v29  ;;  %v3998_v53 = vsub.f32 %v3956_v39, %v1284_v62 }
  0x5a   :  { %3237 = vmatprep.subr.bf16.mxu0 %v3236_v4  ;;  %v1239_v40 = vand.u32 4294901760, %v1167_v20  ;;  %v4032_v3 = vpack.c.bf16 %v1287_v12, %v1284_v62 }
  0x5b   :  { %v3966_v52 = vsub.f32 %v1162_v16, %v1224_v59  ;;  %v3986_v4 = vpack.c.bf16 %v1227_v60, %v1224_v59  ;;  %v1166_v16 = vld [vmem:[%s4317_s2 + $0x60] sm:$0xff]  ;;  %v1184_v59 = vld [vmem:[%s4317_s2 + $0xf0] sm:$0xff]  ;;  %v1185_v60 = vld [vmem:[%s4317_s2 + $0xf8] sm:$0xff] }
  0x5c   :  { %3175 = vmatpush3.bf16.msra.mxu1 %v3898_v32  ;;  %v1236_v29 = vand.u32 4294901760, %v1166_v16  ;;  %v1404_v47 = vsub.f32 %v1167_v20, %v1239_v40  ;;  %4342 = vst [vmem:[#allocation7_spill] sm:$0xff] %v4032_v3 }
  0x5d   :  { %3239 = vmatpush3.bf16.msra.mxu0 %v3238_v23  ;;  %3177 = vmatprep.subr.bf16.mxu1 %v3905_v19  ;;  %4340 = vst [vmem:[#allocation5_spill] sm:$0xff] %v3986_v4  ;;  %v3250_v21 = vpack.c.bf16 %v3968_v56, %v3966_v52  ;;  %v3992_v23 = vsub.f32 %v1165_v26, %v1233_v58  ;;  %v1169_v26 = vld [vmem:[%s4317_s2 + $0x78] sm:$0xff] }
  0x5e   :  { %3241 = vmatprep.subr.bf16.mxu0 %v3240_v35  ;;  %v3256_v35 = vpack.c.bf16 %v4001_v33, %v3998_v53  ;;  %v1397_v41 = vsub.f32 %v1166_v16, %v1236_v29 }
  0x5f   :  { %v3254_v34 = vpack.c.bf16 %v3992_v23, %v3990_v54 }
  0x60   :  { %3179 = vmatpush3.bf16.msra.mxu1 %v3922_v42  ;;  %v3258_v39 = vpack.c.bf16 %v1404_v47, %v1397_v41 }
  0x61   :  { %3243 = vmatpush3.bf16.msra.mxu0 %v3242_v63  ;;  %3181 = vmatprep.subr.bf16.mxu1 %v3937_v0  ;;  %v1290_v63 = vand.u32 4294901760, %v1184_v59 }
  0x62   :  { %3245 = vmatprep.subr.bf16.mxu0 %v3244_v17  ;;  %v1293_v17 = vand.u32 4294901760, %v1185_v60 }
  0x64   :  { %3183 = vmatpush3.bf16.msra.mxu1 %v3970_v46 }
  0x65   :  { %3247 = vmatpush3.bf16.msra.mxu0 %v3246_v45  ;;  %3185 = vmatprep.subr.bf16.mxu1 %v3976_v15  ;;  %v1245_v45 = vand.u32 4294901760, %v1169_v26 }
  0x66   :  { %3249 = vmatprep.subr.bf16.mxu0 %v3248_v36  ;;  %v4026_v36 = vpack.c.bf16 %v1281_v8, %v1278_v1  ;;  %v1433_v1 = vand.u32 4294901760, %v3823_v6  ;;  %v4036_v8 = vpack.c.bf16 %v1239_v40, %v1236_v29  ;;  %v1398_v40 = vand.u32 4294901760, %v1397_v41 }
  0x67   :  { %v1418_v16 = vsub.f32 %v1169_v26, %v1245_v45 }
  0x68   :  { %3187 = vmatpush3.bf16.msra.mxu1 %v3986_v4  ;;  %v1426_v4 = vand.u32 4294901760, %v3821_v24  ;;  %4343 = vst [vmem:[#allocation8_spill] sm:$0xff] %v4036_v8  ;;  %v1434_v62 = vsub.f32 %v3823_v6, %v1433_v1 }
  0x69   :  { %3251 = vmatpush3.bf16.msra.mxu0 %v3250_v21  ;;  %v1523_v21 = vsub.f32 %v1184_v59, %v1290_v63  ;;  %3189 = vmatprep.subr.bf16.mxu1 %v4026_v36 }
  0x6a   :  { %3253 = vmatprep.subr.bf16.mxu0 %v3252_v30  ;;  %v1530_v30 = vsub.f32 %v1185_v60, %v1293_v17  ;;  %v1427_v59 = vsub.f32 %v3821_v24, %v1426_v4  ;;  %v4043_v60 = vpack.c.bf16 %v1245_v45, %v1242_v13  ;;  %v1419_v24 = vand.u32 4294901760, %v1418_v16 }
  0x6c   :  { %v3260_v20 = vpack.c.bf16 %v1530_v30, %v1523_v21  ;;  %4345 = vst [vmem:[#allocation10_spill] sm:$0xff] %v4043_v60  ;;  %v1428_v12 = vand.u32 4294901760, %v1427_v59 }
  0x6d   :  { %3255 = vmatpush3.bf16.msra.mxu0 %v3254_v34  ;;  %v4028_v34 = vpack.c.bf16 %v1233_v58, %v1230_v57  ;;  %v3296_v57 = vpack.c.bf16 %v1433_v1, %v1426_v4  ;;  %v4040_v58 = vpack.c.bf16 %v1293_v17, %v1290_v63  ;;  %v1524_v63 = vand.u32 4294901760, %v1523_v21 }
  0x6e   :  { %3257 = vmatprep.subr.bf16.mxu0 %v3256_v35  ;;  %v1411_v35 = vsub.f32 %v1168_v9, %v1242_v13  ;;  %v1405_v9 = vand.u32 4294901760, %v1404_v47  ;;  %v1531_v17 = vand.u32 4294901760, %v1530_v30  ;;  %v1399_v13 = vsub.f32 %v1397_v41, %v1398_v40 }
  0x6f   :  { %4341 = vst [vmem:[#allocation6_spill] sm:$0xff] %v4028_v34  ;;  %3191 = vmatpush3.bf16.msra.mxu1 %v4028_v34  ;;  %4344 = vst [vmem:[#allocation9_spill] sm:$0xff] %v4040_v58  ;;  %v1525_v1 = vsub.f32 %v1523_v21, %v1524_v63  ;;  %v1314_v41 = vand.u32 4294901760, %v3833_v14 }
  0x70   :  { %v3262_v10 = vpack.c.bf16 %v1418_v16, %v1411_v35  ;;  %3193 = vmatprep.subr.bf16.mxu1 %v4032_v3  ;;  %v4048_v26 = vpack.c.bf16 %v1405_v9, %v1398_v40  ;;  %v4050_v4 = vpack.c.bf16 %v1531_v17, %v1524_v63  ;;  %v1406_v45 = vsub.f32 %v1404_v47, %v1405_v9 }
  0x71   :  { %3259 = vmatpush3.bf16.msra.mxu0 %v3258_v39  ;;  %v1412_v39 = vand.u32 4294901760, %v1411_v35  ;;  %v1321_v47 = vand.u32 4294901760, %v3835_v31  ;;  %v1315_v21 = vsub.f32 %v3833_v14, %v1314_v41 }
  0x72   :  { %3261 = vmatprep.subr.bf16.mxu0 %v3260_v20  ;;  %v1400_v20 = vand.u32 4294901760, %v1399_v13  ;;  %v1407_v59 = vand.u32 4294901760, %v1406_v45 }
  0x73   :  { %3195 = vmatpush3.bf16.msra.mxu1 %v4036_v8  ;;  %v4052_v6 = vpack.c.bf16 %v1419_v24, %v1412_v39  ;;  %v1322_v40 = vsub.f32 %v3835_v31, %v1321_v47  ;;  %v3298_v45 = vpack.c.bf16 %v1321_v47, %v1314_v41 }
  0x74   :  { %3197 = vmatprep.subr.bf16.mxu1 %v4040_v58 }
  0x75   :  { %3263 = vmatpush3.bf16.msra.mxu0 %v3262_v10  ;;  %v1435_v10 = vand.u32 4294901760, %v1434_v62  ;;  %v1413_v62 = vsub.f32 %v1411_v35, %v1412_v39  ;;  %v1440_v35 = vand.u32 4294901760, %v3847_v2  ;;  %v1323_v31 = vand.u32 4294901760, %v1322_v40 }
  0x76   :  { %3297 = vmatprep.subr.bf16.mxu0 %v3296_v57  ;;  %v1532_v57 = vsub.f32 %v1530_v30, %v1531_v17  ;;  %v1328_v17 = vand.u32 4294901760, %v3854_v22  ;;  %v1342_v40 = vand.u32 4294901760, %v3896_v28 }
  0x77   :  { %3199 = vmatpush3.bf16.msra.mxu1 %v4043_v60  ;;  %v3200_v29 = vpack.c.bf16 %v1435_v10, %v1428_v12  ;;  %v1526_v12 = vand.u32 4294901760, %v1525_v1  ;;  %v4054_v60 = vpack.c.bf16 %v1407_v59, %v1400_v20  ;;  %v1414_v58 = vand.u32 4294901760, %v1413_v62 }
  0x78   :  { %v1533_v10 = vand.u32 4294901760, %v1532_v57  ;;  %v1316_v20 = vand.u32 4294901760, %v1315_v21  ;;  %v1454_v57 = vand.u32 4294901760, %v3871_v37  ;;  %v1461_v59 = vand.u32 4294901760, %v3873_v38 }
  0x79   :  { %3201 = vmatprep.subr.bf16.mxu1 %v3200_v29  ;;  %v1420_v29 = vsub.f32 %v1418_v16, %v1419_v24  ;;  %v1447_v16 = vand.u32 4294901760, %v3849_v11  ;;  %v1441_v24 = vsub.f32 %v3847_v2, %v1440_v35  ;;  %v1329_v2 = vsub.f32 %v3854_v22, %v1328_v17 }
  0x7a   :  { %v4056_v8 = vpack.c.bf16 %v1533_v10, %v1526_v12 }
  0x7b   :  { %v1421_v3 = vand.u32 4294901760, %v1420_v29  ;;  %v1448_v14 = vsub.f32 %v3849_v11, %v1447_v16  ;;  %v3300_v12 = vpack.c.bf16 %v1447_v16, %v1440_v35  ;;  %v1442_v29 = vand.u32 4294901760, %v1441_v24 }
  0x7c   :  { %v3202_v35 = vpack.c.bf16 %v1323_v31, %v1316_v20  ;;  %v3304_v16 = vpack.c.bf16 %v1461_v59, %v1454_v57  ;;  %v1356_v20 = vand.u32 4294901760, %v3930_v49  ;;  %v1363_v31 = vand.u32 4294901760, %v3932_v50 }
  0x7d   :  { %v4058_v34 = vpack.c.bf16 %v1421_v3, %v1414_v58  ;;  %v1335_v3 = vand.u32 4294901760, %v3856_v55  ;;  %v1449_v41 = vand.u32 4294901760, %v1448_v14 }
  0x7f   :  { %v3302_v10 = vpack.c.bf16 %v1335_v3, %v1328_v17  ;;  %v1336_v47 = vsub.f32 %v3856_v55, %v1335_v3  ;;  %v1462_v55 = vsub.f32 %v3873_v38, %v1461_v59  ;;  %v1330_v3 = vand.u32 4294901760, %v1329_v2 }
  0x80   :  { %v3204_v24 = vpack.c.bf16 %v1449_v41, %v1442_v29  ;;  %v1482_v41 = vand.u32 4294901760, %v3942_v5 }
  0x81   :  { %v1337_v14 = vand.u32 4294901760, %v1336_v47  ;;  %v1489_v47 = vand.u32 4294901760, %v3944_v7 }
 0x12a   :  { %v4063_v30 = vpop.f32.mrb[0].mxu1 }
 0x12b   :  { %v638_v9 = vpop.f32.mrb[0].mxu0  ;;  %v2963_v63 = vpop.f32.mrb[1].mxu1 }
 0x12c   :  { %v4070_v58 = vand.u32 4294901760, %v638_v9  ;;  %v640_v39 = vpop.f32.mrb[1].mxu0  ;;  %v1455_v63 = vsub.f32 %v3871_v37, %v1454_v57  ;;  %v1468_v37 = vand.u32 4294901760, %v3913_v25  ;;  %v1343_v57 = vsub.f32 %v3896_v28, %v1342_v40 }
 0x12d   :  { %v4074_v13 = vand.u32 4294901760, %v640_v39  ;;  %v1357_v28 = vsub.f32 %v3930_v49, %v1356_v20  ;;  %v1377_v49 = vand.u32 4294901760, %v3968_v56 }
 0x12e   :  { %v4077_v1 = vsub.f32 %v638_v9, %v4070_v58  ;;  %v1349_v9 = vand.u32 4294901760, %v3902_v18  ;;  %v1469_v2 = vsub.f32 %v3913_v25, %v1468_v37  ;;  %v1344_v25 = vand.u32 4294901760, %v1343_v57 }
 0x12f   :  { %v4082_v62 = vsub.f32 %v640_v39, %v4074_v13  ;;  %v1475_v39 = vand.u32 4294901760, %v3915_v27  ;;  %v1391_v57 = vand.u32 4294901760, %v3992_v23 }
 0x130   :  { %4346 = vst [vmem:[#allocation11_spill] sm:$0xff] %v4077_v1  ;;  %v4336_v11 = vand.u32 4294901760, %v4077_v1  ;;  %v1350_v59 = vsub.f32 %v3902_v18, %v1349_v9  ;;  %v1364_v18 = vsub.f32 %v3932_v50, %v1363_v31  ;;  %v1496_v50 = vand.u32 4294901760, %v3974_v48 }
 0x131   :  { %v4337_v21 = vand.u32 4294901760, %v4082_v62  ;;  %1673 = vmatprep.mubr.f32.mxu0 %v4082_v62  ;;  %v3308_v29 = vpack.c.bf16 %v1475_v39, %v1468_v37 }
 0x132   :  { %v1304_v22 = vsub.f32 %v4077_v1, %v4336_v11  ;;  %1676 = vmatmul.mubr.f32.vlgmr.msra.gmra.mrb[2].mxu0 %v4077_v1  ;;  %v1476_v1 = vsub.f32 %v3915_v27, %v1475_v39  ;;  %v1351_v27 = vand.u32 4294901760, %v1350_v59 }
 0x133   :  { %3299 = vmatpush3.bf16.msra.mxu0 %v3298_v45  ;;  %1950 = vmatprep.mubr.f32.mxu0 %v4074_v13  ;;  %v1298_v17 = vsub.f32 %v4082_v62, %v4337_v21  ;;  %v1456_v45 = vand.u32 4294901760, %v1455_v63  ;;  %v1463_v21 = vand.u32 4294901760, %v1462_v55  ;;  %v3206_v63 = vpack.c.bf16 %v1337_v14, %v1330_v3 }
 0x134   :  { %3301 = vmatprep.subr.bf16.mxu0 %v3300_v12  ;;  %v1305_v11 = vand.u32 4294901760, %v1304_v22  ;;  %v3306_v12 = vpack.c.bf16 %v1349_v9, %v1342_v40  ;;  %v1490_v40 = vsub.f32 %v3944_v7, %v1489_v47  ;;  %v1370_v22 = vand.u32 4294901760, %v3966_v52 }
 0x135   :  { %v1299_v38 = vand.u32 4294901760, %v1298_v17  ;;  %v3208_v9 = vpack.c.bf16 %v1463_v21, %v1456_v45  ;;  %v3310_v55 = vpack.c.bf16 %v1363_v31, %v1356_v20  ;;  %v3312_v17 = vpack.c.bf16 %v1489_v47, %v1482_v41 }
 0x136   :  { %v1358_v3 = vand.u32 4294901760, %v1357_v28  ;;  %v1371_v7 = vsub.f32 %v3966_v52, %v1370_v22  ;;  %v3210_v21 = vpack.c.bf16 %v1351_v27, %v1344_v25  ;;  %v1491_v39 = vand.u32 4294901760, %v1490_v40  ;;  %v1186_v25 = vld [vmem:[%s4317_s2 + $0x100] sm:$0xff] }
 0x137   :  { %3303 = vmatpush3.bf16.msra.mxu0 %v3302_v10  ;;  %1300 = vmatprep.mubr.f32.mxu1 %v1299_v38  ;;  %v1483_v10 = vsub.f32 %v3942_v5, %v1482_v41  ;;  %v1365_v5 = vand.u32 4294901760, %v1364_v18  ;;  %v1497_v14 = vsub.f32 %v3974_v48, %v1496_v50  ;;  %v3314_v31 = vpack.c.bf16 %v1377_v49, %v1370_v22 }
 0x138   :  { %1306 = vmatmul.mubr.f32.vlgmr.msra.gmra.mrb[2].mxu1 %v1305_v11  ;;  %3305 = vmatprep.subr.bf16.mxu0 %v3304_v16  ;;  %v1470_v11 = vand.u32 4294901760, %v1469_v2  ;;  %v1477_v16 = vand.u32 4294901760, %v1476_v1  ;;  %v1378_v1 = vsub.f32 %v3968_v56, %v1377_v49  ;;  %v1384_v45 = vand.u32 4294901760, %v3990_v54  ;;  %v1188_v49 = vld [vmem:[%s4317_s2 + $0x110] sm:$0xff] }
 0x139   :  { %3203 = vmatpush3.bf16.msra.mxu1 %v3202_v35  ;;  %1536 = vmatprep.mubr.f32.mxu1 %v4074_v13  ;;  %v1503_v35 = vand.u32 4294901760, %v3981_v44  ;;  %v1484_v37 = vand.u32 4294901760, %v1483_v10  ;;  %v3214_v52 = vpack.c.bf16 %v1365_v5, %v1358_v3  ;;  %v1372_v59 = vand.u32 4294901760, %v1371_v7 }
 0x13a   :  { %3205 = vmatprep.subr.bf16.mxu1 %v3204_v24  ;;  %v3212_v24 = vpack.c.bf16 %v1477_v16, %v1470_v11  ;;  %v1510_v2 = vand.u32 4294901760, %v3998_v53  ;;  %v1517_v56 = vand.u32 4294901760, %v4001_v33  ;;  %v1385_v48 = vsub.f32 %v3990_v54, %v1384_v45  ;;  %v1187_v54 = vld [vmem:[%s4317_s2 + $0x108] sm:$0xff] }
 0x13b   :  { %3307 = vmatpush3.bf16.msra.mxu0 %v3306_v12  ;;  %v1504_v20 = vsub.f32 %v3981_v44, %v1503_v35  ;;  %v3316_v38 = vpack.c.bf16 %v1503_v35, %v1496_v50  ;;  %v3216_v12 = vpack.c.bf16 %v1491_v39, %v1484_v37  ;;  %v1392_v44 = vsub.f32 %v3992_v23, %v1391_v57  ;;  %v1189_v50 = vld [vmem:[%s4317_s2 + $0x118] sm:$0xff] }
 0x13c   :  { %3309 = vmatprep.subr.bf16.mxu0 %v3308_v29  ;;  %v1379_v29 = vand.u32 4294901760, %v1378_v1  ;;  %v1498_v41 = vand.u32 4294901760, %v1497_v14  ;;  %v1518_v28 = vsub.f32 %v4001_v33, %v1517_v56  ;;  %v3318_v18 = vpack.c.bf16 %v1391_v57, %v1384_v45  ;;  %v1190_v1 = vld [vmem:[%s4317_s2 + $0x120] sm:$0x1]  ;;  %s3462_s2 = smov [#allocation2]  }
 0x13d   :  { %3207 = vmatpush3.bf16.msra.mxu1 %v3206_v63  ;;  %v1505_v47 = vand.u32 4294901760, %v1504_v20  ;;  %v1511_v63 = vsub.f32 %v3998_v53, %v1510_v2  ;;  %v3320_v27 = vpack.c.bf16 %v1517_v56, %v1510_v2  ;;  %v1386_v10 = vand.u32 4294901760, %v1385_v48  ;;  %s2578_s10 = sshll.u32 %s3462_s2, 4  ;;  %s2579_s10 = int_to_ptr.vmem [resolvable:$true] %s2578_s10 }
 0x13e   :  { %3209 = vmatprep.subr.bf16.mxu1 %v3208_v9  ;;  %v3218_v23 = vpack.c.bf16 %v1379_v29, %v1372_v59  ;;  %v1393_v40 = vand.u32 4294901760, %v1392_v44  ;;  %v1519_v9 = vand.u32 4294901760, %v1518_v28  ;;  %v2062_v22 = vand.u32 4294901760, %v1186_v25  ;;  %s3435_s11 = scalar_lea.vmem %s2579_s10, 128  ;;  %p3440_p1 = scmp.lt.s32.totalorder %s2579_s10, %s2579_s10 }
 0x13f   :  { %3311 = vmatpush3.bf16.msra.mxu0 %v3310_v55  ;;  %v3220_v53 = vpack.c.bf16 %v1505_v47, %v1498_v41  ;;  %v1512_v33 = vand.u32 4294901760, %v1511_v63  ;;  %v1193_v11 = vsel %vm1191_vm3, %v4063_v30, 0  ;;  %v2065_v16 = vand.u32 4294901760, %v1187_v54  ;;  %p3436_p0 = scmp.ne.s32.totalorder %s2579_s10, %s3435_s11  ;;  %p3441_p2 = scmp.lt.s32.totalorder %s3435_s11, %s3435_s11 }
 0x140   :  { %3313 = vmatprep.subr.bf16.mxu0 %v3312_v17  ;;  %v4139_v55 = vsub.f32 %v1186_v25, %v2062_v22  ;;  %v3222_v35 = vpack.c.bf16 %v1393_v40, %v1386_v10  ;;  %v4149_v3 = vand.u32 4294901760, %v1193_v11  ;;  %v2068_v5 = vand.u32 4294901760, %v1188_v49  ;;  %v4351_v10 = vld [vmem:[#allocation6_spill] sm:$0xff]  ;;  %v4352_v40 = vld [vmem:[#allocation7_spill] sm:$0xff] }
 0x141   :  { %3211 = vmatpush3.bf16.msra.mxu1 %v3210_v21  ;;  %v4147_v17 = vsub.f32 %v1187_v54, %v2065_v16  ;;  %v3224_v30 = vpack.c.bf16 %v1519_v9, %v1512_v33  ;;  %v2071_v7 = vand.u32 4294901760, %v1189_v50  ;;  %v4347_v14 = vmov 0.0|0.0   ;;  %v4354_v33 = vld [vmem:[#allocation9_spill] sm:$0xff]  ;;  %v4355_v9 = vld [vmem:[#allocation10_spill] sm:$0xff]  ;;  %p3442_p3 = por %p3441_p2, %p3440_p1 }
 0x142   :  { %3213 = vmatprep.subr.bf16.mxu1 %v3212_v24  ;;  %v2144_v21 = vand.u32 4294901760, %v4139_v55  ;;  %v4154_v37 = vsub.f32 %v1188_v49, %v2068_v5  ;;  %v1197_v20 = vsel %vm1195_vm4, %v1190_v1, 0 }
 0x143   :  { %3315 = vmatpush3.bf16.msra.mxu0 %v3314_v31  ;;  %v4156_v39 = vsub.f32 %v1189_v50, %v2071_v7  ;;  %v2151_v24 = vand.u32 4294901760, %v4147_v17  ;;  %v4184_v59 = vand.u32 4294901760, %v1197_v20  ;;  %p3443_p4 = pnand %p3442_p3, %p3436_p0 }
 0x144   :  { %3317 = vmatprep.subr.bf16.mxu0 %v3316_v38  ;;  %v2145_v31 = vsub.f32 %v4139_v55, %v2144_v21  ;;  %v2158_v45 = vand.u32 4294901760, %v4154_v37 }
 0x145   :  { %3215 = vmatpush3.bf16.msra.mxu1 %v3214_v52  ;;  %v2152_v38 = vsub.f32 %v4147_v17, %v2151_v24  ;;  %v2165_v57 = vand.u32 4294901760, %v4156_v39  ;;  %v4182_v52 = vpack.c.bf16 %v2071_v7, %v2068_v5  ;;  %v4191_v56 = vsub.f32 %v1197_v20, %v4184_v59 }
 0x146   :  { %3217 = vmatprep.subr.bf16.mxu1 %v3216_v12  ;;  %v2146_v2 = vand.u32 4294901760, %v2145_v31  ;;  %v3376_v54 = vpack.c.bf16 %v4156_v39, %v4154_v37 }
 0x147   :  { %3319 = vmatpush3.bf16.msra.mxu0 %v3318_v18  ;;  %v2153_v12 = vand.u32 4294901760, %v2152_v38  ;;  %v2166_v29 = vsub.f32 %v4156_v39, %v2165_v57  ;;  %v2172_v63 = vand.u32 4294901760, %v4191_v56 }
 0x148   :  { %3321 = vmatprep.subr.bf16.mxu0 %v3320_v27  ;;  %v3373_v27 = vpack.c.bf16 %v4147_v17, %v4139_v55 }
 0x149   :  { %3219 = vmatpush3.bf16.msra.mxu1 %v3218_v23  ;;  %v3367_v44 = vpack.c.bf16 %v2153_v12, %v2146_v2  ;;  %v2167_v47 = vand.u32 4294901760, %v2166_v29  ;;  %v4350_v23 = vld [vmem:[#allocation5_spill] sm:$0xff] }
 0x14a   :  { %3221 = vmatprep.subr.bf16.mxu1 %v3220_v53  ;;  %v4353_v53 = vld [vmem:[#allocation8_spill] sm:$0xff] }
 0x14b   :  { %3323 = vmatpush3.bf16.msra.mxu0 %v4048_v26  ;;  %v4163_v26 = vsub.f32 %v1193_v11, %v4149_v3 }
 0x14c   :  { %3325 = vmatprep.subr.bf16.mxu0 %v4050_v4  ;;  %v4166_v4 = vpack.c.bf16 %v2065_v16, %v2062_v22  ;;  %v4356_v22 = vld [vmem:[#allocation11_spill] sm:$0xff]  ;;  %v3385_v16 = vpack.c.bf16 %v2151_v24, %v2144_v21 }
 0x14d   :  { %3223 = vmatpush3.bf16.msra.mxu1 %v3222_v35  ;;  %v4357_v11 = vand.u32 4294901760, %v4356_v22 }
 0x14e   :  { %3225 = vmatprep.subr.bf16.mxu1 %v3224_v30 }
 0x14f   :  { %3327 = vmatpush3.bf16.msra.mxu0 %v4052_v6  ;;  %v2133_v6 = vand.u32 4294901760, %v4163_v26 }
 0x150   :  { %3360 = vmatprep.subr.bf16.mxu0 %v4347_v14 }
 0x151   :  { %3227 = vmatpush3.bf16.msra.mxu1 %v4054_v60  ;;  %v4348_v60 = vmov 0.0   ;;  %v2134_v48 = vsub.f32 %v4163_v26, %v2133_v6 }
 0x152   :  { %1952 = vmatmul.mubr.f32.vlgmr.msra.gmra.mrb[4].mxu0 %v4070_v58  ;;  %3229 = vmatprep.subr.bf16.mxu1 %v4056_v8  ;;  %v2159_v8 = vsub.f32 %v4154_v37, %v2158_v45 }
 0x153   :  { %3362 = vmatpush3.bf16.msra.mxu0 %v4166_v4  ;;  %2974 = vmatprep.mubr.msk.f32.mxu0 %vm3461_vm1, %v4348_v60  ;;  %v2135_v28 = vand.u32 4294901760, %v2134_v48 }
 0x154   :  { %3363 = vmatprep.subr.bf16.mxu0 %v4347_v14  ;;  %v2160_v41 = vand.u32 4294901760, %v2159_v8 }
 0x155   :  { %3231 = vmatpush3.bf16.msra.mxu1 %v4058_v34  ;;  %v4349_v34 = vand.u32 4294901760, %v4082_v62  ;;  %v2173_v62 = vsub.f32 %v4191_v56, %v2172_v63 }
 0x156   :  { %3265 = vmatprep.subr.bf16.mxu1 %v3839_v43  ;;  %v3370_v18 = vpack.c.bf16 %v2167_v47, %v2160_v41 }
 0x157   :  { %3365 = vmatpush3.bf16.msra.mxu0 %v4182_v52  ;;  %v2174_v25 = vand.u32 4294901760, %v2173_v62 }
 0x158   :  { %1538 = vmatmul.mubr.f32.vlgmr.msra.gmra.mrb[4].mxu1 %v4070_v58  ;;  %2972 = vmatprep.subr.mxu0 %v4348_v60 }
 0x159   :  { %3267 = vmatpush3.bf16.msra.mxu1 %v3867_v51  ;;  %1780 = vmatprep.mubr.f32.mxu1 %v4349_v34 }
 0x15a   :  { %3269 = vmatprep.subr.bf16.mxu1 %v3875_v61 }
 0x15b   :  { %2973 = vmatpush3.msra.mxu0 %v4184_v59 }
 0x15c   :  { %2975 = vmatmul.mubr.f32.vlgmr.msra.gmra.mrb[6].mxu0 %v2135_v28  ;;  %3366 = vmatprep.subr.bf16.mxu0 %v4347_v14 }
 0x15d   :  { %3271 = vmatpush3.bf16.msra.mxu1 %v3898_v32  ;;  %3368 = vmatpush3.bf16.msra.mxu0 %v3367_v44 }
 0x15e   :  { %3273 = vmatprep.subr.bf16.mxu1 %v3905_v19  ;;  %3369 = vmatprep.subr.bf16.mxu0 %v4347_v14 }
 0x15f   :  { %2987 = vmatprep.mubr.msk.f32.mxu0 %vm3461_vm1, %v4348_v60 }
 0x161   :  { %3275 = vmatpush3.bf16.msra.mxu1 %v3922_v42  ;;  %3371 = vmatpush3.bf16.msra.mxu0 %v3370_v18 }
 0x162   :  { %3277 = vmatprep.subr.bf16.mxu1 %v3937_v0  ;;  %2985 = vmatprep.subr.mxu0 %v4348_v60 }
 0x165   :  { %3279 = vmatpush3.bf16.msra.mxu1 %v3970_v46  ;;  %2986 = vmatpush3.msra.mxu0 %v2174_v25 }
 0x166   :  { %2988 = vmatmul.mubr.f32.vlgmr.msra.gmra.mrb[6].mxu0 %v4149_v3  ;;  %3372 = vmatprep.subr.bf16.mxu0 %v4347_v14 }
 0x167   :  { %3374 = vmatpush3.bf16.msra.mxu0 %v3373_v27  ;;  %3281 = vmatprep.subr.bf16.mxu1 %v3976_v15 }
 0x168   :  { %3375 = vmatprep.subr.bf16.mxu0 %v4347_v14  ;;  %3000 = vmatprep.mubr.msk.f32.mxu0 %vm3461_vm1, %v4348_v60 }
 0x169   :  { %3283 = vmatpush3.bf16.msra.mxu1 %v4350_v23 }
 0x16a   :  { %3285 = vmatprep.subr.bf16.mxu1 %v4026_v36 }
 0x16b   :  { %3377 = vmatpush3.bf16.msra.mxu0 %v3376_v54 }
 0x16c   :  { %2998 = vmatprep.subr.mxu0 %v4348_v60 }
 0x16d   :  { %3287 = vmatpush3.bf16.msra.mxu1 %v4351_v10 }
 0x16e   :  { %3289 = vmatprep.subr.bf16.mxu1 %v4352_v40 }
 0x16f   :  { %2999 = vmatpush3.msra.mxu0 %v4191_v56 }
 0x170   :  { %3001 = vmatmul.mubr.f32.vlgmr.msra.gmra.mrb[6].mxu0 %v4163_v26  ;;  %3378 = vmatprep.subr.bf16.mxu0 %v4347_v14 }
 0x171   :  { %3291 = vmatpush3.bf16.msra.mxu1 %v4353_v53  ;;  %3380 = vmatpush3.bf16.msra.mxu0 %v4166_v4 }
 0x172   :  { %3293 = vmatprep.subr.bf16.mxu1 %v4354_v33  ;;  %3381 = vmatprep.subr.bf16.mxu0 %v4347_v14 }
 0x173   :  { %3013 = vmatprep.mubr.msk.f32.mxu0 %vm3461_vm1, %v4348_v60 }
 0x175   :  { %3295 = vmatpush3.bf16.msra.mxu1 %v4355_v9  ;;  %3383 = vmatpush3.bf16.msra.mxu0 %v4182_v52 }
 0x176   :  { %3329 = vmatprep.subr.bf16.mxu1 %v3839_v43  ;;  %3011 = vmatprep.subr.mxu0 %v4348_v60  ;;  %v3388_v43 = vpack.c.bf16 %v2165_v57, %v2158_v45 }
 0x178   :  { %1784 = vmatmul.mubr.f32.vlgmr.msra.gmra.mrb[6].mxu1 %v4357_v11 }
 0x179   :  { %3331 = vmatpush3.bf16.msra.mxu1 %v3867_v51  ;;  %2054 = vmatprep.mubr.f32.mxu1 %v4074_v13 }
 0x17a   :  { %3012 = vmatpush3.msra.mxu0 %v4184_v59  ;;  %3333 = vmatprep.subr.bf16.mxu1 %v3875_v61 }
 0x17b   :  { %3014 = vmatmul.mubr.f32.vlgmr.msra.gmra.mrb[6].mxu0 %v2133_v6  ;;  %3384 = vmatprep.subr.bf16.mxu0 %v4347_v14 }
 0x17c   :  { %3386 = vmatpush3.bf16.msra.mxu0 %v3385_v16  ;;  %3026 = vmatprep.mubr.msk.f32.mxu0 %vm3461_vm1, %v4348_v60 }
 0x17d   :  { %3335 = vmatpush3.bf16.msra.mxu1 %v3898_v32  ;;  %3387 = vmatprep.subr.bf16.mxu0 %v4347_v14 }
 0x17e   :  { %3337 = vmatprep.subr.bf16.mxu1 %v3905_v19 }
 0x180   :  { %3389 = vmatpush3.bf16.msra.mxu0 %v3388_v43 }
 0x181   :  { %3339 = vmatpush3.bf16.msra.mxu1 %v3922_v42  ;;  %3024 = vmatprep.subr.mxu0 %v4348_v60 }
 0x182   :  { %3341 = vmatprep.subr.bf16.mxu1 %v3937_v0 }
 0x184   :  { %3025 = vmatpush3.msra.mxu0 %v2172_v63 }
 0x185   :  { %3027 = vmatmul.mubr.f32.vlgmr.msra.gmra.mrb[6].mxu0 %v4149_v3  ;;  %3390 = vmatprep.subr.bf16.mxu0 %v4347_v14 }
 0x186   :  { %3343 = vmatpush3.bf16.msra.mxu1 %v3970_v46  ;;  %3392 = vmatpush3.bf16.msra.mxu0 %v4166_v4 }
 0x187   :  { %3345 = vmatprep.subr.bf16.mxu1 %v3976_v15  ;;  %3393 = vmatprep.subr.bf16.mxu0 %v4347_v14 }
 0x188   :  { %3039 = vmatprep.mubr.msk.f32.mxu0 %vm3461_vm1, %v4348_v60 }
 0x18a   :  { %3347 = vmatpush3.bf16.msra.mxu1 %v4350_v23  ;;  %3395 = vmatpush3.bf16.msra.mxu0 %v4182_v52 }
 0x18b   :  { %3349 = vmatprep.subr.bf16.mxu1 %v4026_v36  ;;  %3037 = vmatprep.subr.mxu0 %v4348_v60 }
 0x18e   :  { %3351 = vmatpush3.bf16.msra.mxu1 %v4351_v10  ;;  %3038 = vmatpush3.msra.mxu0 %v4184_v59 }
 0x18f   :  { %3040 = vmatmul.mubr.f32.vlgmr.msra.gmra.mrb[6].mxu0 %v4149_v3  ;;  %3353 = vmatprep.subr.bf16.mxu1 %v4352_v40 }
 0x192   :  { %3355 = vmatpush3.bf16.msra.mxu1 %v4353_v53 }
 0x193   :  { %3357 = vmatprep.subr.bf16.mxu1 %v4354_v33 }
 0x196   :  { %3359 = vmatpush3.bf16.msra.mxu1 %v4355_v9 }
 0x199   :  { %2056 = vmatmul.mubr.f32.vlgmr.msra.gmra.mrb[8].mxu1 %v4070_v58 }
 0x205   :  { %v2730_v51 = vpop.f32.mrb[2].mxu0 }
 0x206   :  { %v2731_v61 = vpop.f32.mrb[3].mxu0 }
 0x207   :  { %v2732_v32 = vadd.f32 %v2731_v61, %v2730_v51 }
 0x20b   :  { %v2660_v19 = vpop.f32.mrb[2].mxu1 }
 0x20c   :  { %v2661_v42 = vpop.f32.mrb[3].mxu1 }
 0x20d   :  { %v2662_v0 = vadd.f32 %v2661_v42, %v2660_v19 }
 0x225   :  { %v2800_v46 = vpop.f32.mrb[4].mxu0 }
 0x226   :  { %v2801_v15 = vpop.f32.mrb[5].mxu0 }
 0x227   :  { %v2802_v36 = vadd.f32 %v2801_v15, %v2800_v46 }
 0x22b   :  { %v2695_v13 = vpop.f32.mrb[4].mxu1 }
 0x22c   :  { %v2696_v55 = vpop.f32.mrb[5].mxu1 }
 0x22d   :  { %v2697_v49 = vadd.f32 %v2696_v55, %v2695_v13 }
 0x22f   :  { %v1540_v50 = vadd.f32 %v2697_v49, %v2662_v0 }
 0x231   :  { %v1678_v35 = vadd.f32 %v2732_v32, %v1540_v50 }
 0x24b   :  { %v2765_v17 = vpop.f32.mrb[6].mxu1 }
 0x24c   :  { %v2766_v3 = vpop.f32.mrb[7].mxu1 }
 0x24d   :  { %v2767_v30 = vadd.f32 %v2766_v3, %v2765_v17 }
 0x24f   :  { %v1786_v5 = vadd.f32 %v2767_v30, %v1678_v35 }
 0x251   :  { %v1954_v7 = vadd.f32 %v2802_v36, %v1786_v5 }
 0x262   :  { %v2555_v58 = vpop.f32.mrb[6].mxu0 }
 0x263   :  { %v3041_v21 = vpop.f32.mrb[7].mxu0 }
 0x26c   :  { %v2835_v37 = vpop.f32.mrb[8].mxu1 }
 0x26d   :  { %v2836_v39 = vpop.f32.mrb[9].mxu1 }
 0x26e   :  { %v2837_v1 = vadd.f32 %v2836_v39, %v2835_v37 }
 0x270   :  { %v2058_v24 = vadd.f32 %v2837_v1, %v1954_v7 }
 0x272   :  { %v3396_v26 = vadd.f32 %v2555_v58, %v2058_v24 }
 0x274   :  { %v2560_v4 = vsel %vm2559_vm5, %v3396_v26, -inf }
 0x275   :  { %2561 = vmax.xlane.f32.xlu0 %v2560_v4 }
 0x302   :  { %v2562_v14 = vpop.xlane.xlu0 %2561 }
 0x303   :  { %v2563_v20 = vsub.f32 %v3396_v26, %v2562_v14 }
 0x305   :  { %v2564_v31 = vmul.f32 1.442695, %v2563_v20 }
 0x307   :  { %3431 = vpow2.f32 %v2564_v31 }
 0x311   :  { %v3432_v38 = vpop.eup %3431 }
 0x312   :  { %v2566_v45 = vsel %vm2559_vm5, %v3432_v38, 0.0 }
 0x313   :  { %2567 = vadd.xlane.f32.xlu0 %v2566_v45 }
 0x3a0   :  { %v2568_v57 = vpop.xlane.xlu0 %2567 }
 0x3a1   :  { %3433 = vrcp.f32 %v2568_v57 }
 0x3ab   :  { %v3434_v6 = vpop.eup %3433 }
 0x3ac   :  { %v2570_v52 = vmul.f32 %v3434_v6, %v3432_v38 }
 0x3ae   :  { %2571 = vst.msk [vmem:[#allocation2] sm:$0xff] %vm2559_vm5, %v2570_v52 }
 0x3af   :  { %3446 = shalt.err (!%p3443_p4)
}
 0x3b0   :  { %s3447_s14 = scalar_lea.hbm %s4318_s3, 128 }
 0x3b1   :  { %p3448_p5 = scmp.ne.s32.totalorder %s4318_s3, %s3447_s14  ;;  %p3451_p6 = scmp.lt.u32.totalorder %s3447_s14, %s4318_s3 }
 0x3b3   :  { %p3453_p7 = pnand %p3451_p6, %p3448_p5 }
 0x3b5   :  { %3456 = shalt.err (!%p3453_p7)
}
 0x3b6   :  { %2581 = dma.vmem_to_hbm [thread:$0]  %s2579_s10, 128, %s4318_s3, [#allocation3]  }
 0x3b7   :  { %3457 = dma.done.wait [#allocation3], 128  }
 0x3b8   :  { %3458 = vsyncadd [#allocation3], 4294967168 }
 0x3b9   :  { %2585 = vsyncpa [#allocation3], 1 }

</bundles_post_ra>
